<compile_context>
chip_gen: v7x
topology: tpu7x:2x2x1
jax: 0.10.0
libtpu: 0.0.40
codegen_flags: <defaults>
</compile_context>

<pallas_src>
import functools

import jax
import jax.numpy as jnp
from jax import lax
from jax.experimental import pallas as pl
from jax.experimental.pallas import tpu as pltpu


# ----------------------------- fused Pallas kernel ----------------------------- #

def _fused_gcn_kernel(layer_num, adj_ref, x_ref, w_ref, b_ref, wfc_ref, bfc_ref, o_ref):
    """Entire GCN forward: A-normalization, L x (GraphConv+ReLU), fc head."""
    n = adj_ref.shape[0]

    # --- dgl.add_self_loop + GraphConv norm='both' normalization (in-kernel) ---
    row_ids = lax.broadcasted_iota(jnp.int32, (n, n), 0)
    col_ids = lax.broadcasted_iota(jnp.int32, (n, n), 1)
    a = adj_ref[...]
    a_hat = jnp.where(row_ids == col_ids, a + 1.0, a)              # A + I
    deg_in = jnp.sum(a_hat, axis=1, keepdims=True)                 # (N, 1) dst in-degree  (XLU)
    deg_out = jnp.sum(a_hat, axis=0, keepdims=True)                # (1, N) src out-degree (XLU)
    a_norm = a_hat * lax.rsqrt(deg_in) * lax.rsqrt(deg_out)        # D_in^-1/2 A_hat D_out^-1/2 (EUP+VPU)

    # --- layer_num x (GraphConv + ReLU); x stays resident in vregs/VMEM ---
    x = x_ref[...]
    for i in range(layer_num):                                     # static unroll (L is tiny)
        agg = jnp.dot(a_norm, x, preferred_element_type=jnp.float32)       # MXU
        h = jnp.dot(agg, w_ref[i], preferred_element_type=jnp.float32)     # MXU
        x = jnp.maximum(h + b_ref[i], 0.0)                                  # VPU

    # --- fc head: Flatten(start_dim=0) + ReLU + Linear ---
    # x >= 0 already (last layer ReLU), so the fc ReLU is a no-op and is dropped.
    # out[o] = sum_{n,d} x[n,d] * W_fc[n*D+d, o]; OUT is tiny so contract on the
    # VPU/XLU instead of an M=1, lane-width-8 MXU matmul.
    prod = x[None, :, :] * wfc_ref[...]                            # (OUT, N, D)
    part = jnp.sum(prod, axis=2)                                   # (OUT, N)
    out = jnp.sum(part, axis=1, keepdims=True)                     # (OUT, 1)
    o_ref[...] = out + bfc_ref[...]


# ------------------------- one-time parameter preparation ----------------------- #

def prepare_params(w_stacked, b_stacked, w_fc, b_fc, graph_size, in_dim):
    """Run ONCE at init (outside the per-call path): re-layout the fc weight so
    wfc_t[o, n, d] == w_fc[n*D + d, o] (row-major, matches Flatten(start_dim=0))
    and give the biases kernel-friendly 2-D/3-D shapes."""
    L, D, _ = w_stacked.shape
    out_dim = w_fc.shape[1]
    assert D == in_dim and w_fc.shape[0] == graph_size * in_dim
    wfc_t = jnp.transpose(w_fc).reshape(out_dim, graph_size, in_dim)
    b3 = b_stacked.reshape(L, 1, D)
    bfc2 = b_fc.reshape(out_dim, 1)
    return w_stacked, b3, wfc_t, bfc2


# ---------------------------------- forward ------------------------------------- #

@jax.jit
def gcn_forward(adj, feats, w_stacked, b3, wfc_t, bfc2):
    """adj: (N,N) dense adjacency (no self loops; kernel adds them), feats: (N,D),
    w_stacked: (L,D,D), b3: (L,1,D), wfc_t: (OUT,N,D), bfc2: (OUT,1)."""
    L = w_stacked.shape[0]
    out_dim = bfc2.shape[0]

    kernel = functools.partial(_fused_gcn_kernel, L)
    vmem_spec = pl.BlockSpec(memory_space=pltpu.MemorySpace.VMEM)
    out = pl.pallas_call(
        kernel,
        out_shape=jax.ShapeDtypeStruct((out_dim, 1), jnp.float32),
        in_specs=[vmem_spec] * 6,
        out_specs=vmem_spec,
    )(adj, feats, w_stacked, b3, wfc_t, bfc2)
    return out[:, 0]                                               # (out_dim,) like nn.Linear on a 1-D input


# ----------------------------------- main --------------------------------------- #

if __name__ == "__main__":
    N, D, OUT, L = 16, 32, 8, 2                    # graph_size, in_dim, out_dim, layer_num
    key = jax.random.PRNGKey(0)
    keys = jax.random.split(key, 5)

    # deterministic synthetic graph: symmetric adjacency, no self loops (kernel adds them)
    a_rand = jax.random.uniform(keys[0], (N, N))
    adj = ((a_rand + a_rand.T) > 1.2).astype(jnp.float32)
    adj = adj * (1.0 - jnp.eye(N, dtype=jnp.float32))

    feats = jax.random.normal(keys[1], (N, D), dtype=jnp.float32)

    # GraphConv weights: xavier-uniform, bias zeros (DGL GraphConv default init)
    bound_g = (6.0 / (D + D)) ** 0.5
    w_stacked = jax.random.uniform(keys[2], (L, D, D), minval=-bound_g, maxval=bound_g,
                                   dtype=jnp.float32)
    b_stacked = jnp.zeros((L, D), jnp.float32)

    # nn.Linear(in_dim*graph_size, out_dim): uniform(-1/sqrt(fan_in), 1/sqrt(fan_in))
    bound_fc = (1.0 / (N * D)) ** 0.5
    w_fc = jax.random.uniform(keys[3], (N * D, OUT), minval=-bound_fc, maxval=bound_fc,
                              dtype=jnp.float32)
    b_fc = jax.random.uniform(keys[4], (OUT,), minval=-bound_fc, maxval=bound_fc,
                              dtype=jnp.float32)

    # One-time parameter preparation (hoisted out of the per-call jitted path).
    w_p, b3_p, wfc_p, bfc_p = prepare_params(w_stacked, b_stacked, w_fc, b_fc, N, D)
    jax.block_until_ready((w_p, b3_p, wfc_p, bfc_p))

    out = gcn_forward(adj, feats, w_p, b3_p, wfc_p, bfc_p)
    jax.block_until_ready(out)
    assert out.shape == (OUT,)
    print("KERNEL_OK")
</pallas_src>

<mosaic_0001>
module attributes {stable_mosaic.version = 11 : i64} {
  func.func @_fused_gcn_kernel(%arg0: memref<16x16xf32, #tpu.memory_space<vmem>>, %arg1: memref<16x32xf32, #tpu.memory_space<vmem>>, %arg2: memref<2x32x32xf32, #tpu.memory_space<vmem>>, %arg3: memref<2x1x32xf32, #tpu.memory_space<vmem>>, %arg4: memref<8x16x32xf32, #tpu.memory_space<vmem>>, %arg5: memref<8x1xf32, #tpu.memory_space<vmem>>, %arg6: memref<8x1xf32, #tpu.memory_space<vmem>>) attributes {dimension_semantics = [], scalar_prefetch = 0 : i64, scratch_operands = 0 : i64, tpu.core_type = #tpu.core_type<tc>} {
    %0 = tpu.iota {dimensions = array<i32: 0>} : vector<16x16xi32>
    %1 = tpu.iota {dimensions = array<i32: 1>} : vector<16x16xi32>
    %c0 = arith.constant 0 : index
    %c0_0 = arith.constant 0 : index
    %2 = vector.load %arg0[%c0, %c0_0] : memref<16x16xf32, #tpu.memory_space<vmem>>, vector<16x16xf32>
    %3 = arith.cmpi eq, %0, %1 : vector<16x16xi32>
    %cst = arith.constant 1.000000e+00 : f32
    %4 = vector.broadcast %cst : f32 to vector<16x16xf32>
    %5 = arith.addf %2, %4 : vector<16x16xf32>
    %6 = arith.select %3, %5, %2 : vector<16x16xi1>, vector<16x16xf32>
    %cst_1 = arith.constant dense<0.000000e+00> : vector<16xf32>
    %7 = vector.multi_reduction <add>, %6, %cst_1 [1] : vector<16x16xf32> to vector<16xf32>
    %8 = vector.shape_cast %7 : vector<16xf32> to vector<16x1xf32>
    %cst_2 = arith.constant dense<0.000000e+00> : vector<16xf32>
    %9 = vector.multi_reduction <add>, %6, %cst_2 [0] : vector<16x16xf32> to vector<16xf32>
    %10 = vector.shape_cast %9 : vector<16xf32> to vector<1x16xf32>
    %11 = math.rsqrt %8 : vector<16x1xf32>
    %12 = vector.broadcast %11 : vector<16x1xf32> to vector<16x16xf32>
    %13 = arith.mulf %6, %12 : vector<16x16xf32>
    %14 = math.rsqrt %10 : vector<1x16xf32>
    %15 = vector.broadcast %14 : vector<1x16xf32> to vector<16x16xf32>
    %16 = arith.mulf %13, %15 : vector<16x16xf32>
    %c0_3 = arith.constant 0 : index
    %c0_4 = arith.constant 0 : index
    %17 = vector.load %arg1[%c0_3, %c0_4] : memref<16x32xf32, #tpu.memory_space<vmem>>, vector<16x32xf32>
    %cst_5 = arith.constant dense<0.000000e+00> : vector<16x32xf32>
    %18 = tpu.matmul %16, %17, %cst_5 {dimension_numbers = #tpu.dot_dimension_numbers<[1], [0], [0], [1], [0, 0, 1, 1], [], []>} : vector<16x16xf32>, vector<16x32xf32>, vector<16x32xf32> -> vector<16x32xf32>
    %c0_6 = arith.constant 0 : index
    %c0_7 = arith.constant 0 : index
    %c0_8 = arith.constant 0 : index
    %19 = vector.load %arg2[%c0_6, %c0_7, %c0_8] : memref<2x32x32xf32, #tpu.memory_space<vmem>>, vector<1x32x32xf32>
    %20 = vector.shape_cast %19 : vector<1x32x32xf32> to vector<32x32xf32>
    %cst_9 = arith.constant dense<0.000000e+00> : vector<16x32xf32>
    %21 = tpu.matmul %18, %20, %cst_9 {dimension_numbers = #tpu.dot_dimension_numbers<[1], [0], [0], [1], [0, 0, 1, 1], [], []>} : vector<16x32xf32>, vector<32x32xf32>, vector<16x32xf32> -> vector<16x32xf32>
    %c0_10 = arith.constant 0 : index
    %c0_11 = arith.constant 0 : index
    %c0_12 = arith.constant 0 : index
    %22 = vector.load %arg3[%c0_10, %c0_11, %c0_12] : memref<2x1x32xf32, #tpu.memory_space<vmem>>, vector<1x1x32xf32>
    %23 = vector.shape_cast %22 : vector<1x1x32xf32> to vector<1x32xf32>
    %24 = vector.broadcast %23 : vector<1x32xf32> to vector<16x32xf32>
    %25 = arith.addf %21, %24 : vector<16x32xf32>
    %cst_13 = arith.constant 0.000000e+00 : f32
    %26 = vector.broadcast %cst_13 : f32 to vector<16x32xf32>
    %27 = arith.maximumf %25, %26 : vector<16x32xf32>
    %cst_14 = arith.constant dense<0.000000e+00> : vector<16x32xf32>
    %28 = tpu.matmul %16, %27, %cst_14 {dimension_numbers = #tpu.dot_dimension_numbers<[1], [0], [0], [1], [0, 0, 1, 1], [], []>} : vector<16x16xf32>, vector<16x32xf32>, vector<16x32xf32> -> vector<16x32xf32>
    %c1 = arith.constant 1 : index
    %c0_15 = arith.constant 0 : index
    %c0_16 = arith.constant 0 : index
    %29 = vector.load %arg2[%c1, %c0_15, %c0_16] : memref<2x32x32xf32, #tpu.memory_space<vmem>>, vector<1x32x32xf32>
    %30 = vector.shape_cast %29 : vector<1x32x32xf32> to vector<32x32xf32>
    %cst_17 = arith.constant dense<0.000000e+00> : vector<16x32xf32>
    %31 = tpu.matmul %28, %30, %cst_17 {dimension_numbers = #tpu.dot_dimension_numbers<[1], [0], [0], [1], [0, 0, 1, 1], [], []>} : vector<16x32xf32>, vector<32x32xf32>, vector<16x32xf32> -> vector<16x32xf32>
    %c1_18 = arith.constant 1 : index
    %c0_19 = arith.constant 0 : index
    %c0_20 = arith.constant 0 : index
    %32 = vector.load %arg3[%c1_18, %c0_19, %c0_20] : memref<2x1x32xf32, #tpu.memory_space<vmem>>, vector<1x1x32xf32>
    %33 = vector.shape_cast %32 : vector<1x1x32xf32> to vector<1x32xf32>
    %34 = vector.broadcast %33 : vector<1x32xf32> to vector<16x32xf32>
    %35 = arith.addf %31, %34 : vector<16x32xf32>
    %cst_21 = arith.constant 0.000000e+00 : f32
    %36 = vector.broadcast %cst_21 : f32 to vector<16x32xf32>
    %37 = arith.maximumf %35, %36 : vector<16x32xf32>
    %38 = vector.shape_cast %37 : vector<16x32xf32> to vector<1x16x32xf32>
    %c0_22 = arith.constant 0 : index
    %c0_23 = arith.constant 0 : index
    %c0_24 = arith.constant 0 : index
    %39 = vector.load %arg4[%c0_22, %c0_23, %c0_24] : memref<8x16x32xf32, #tpu.memory_space<vmem>>, vector<8x16x32xf32>
    %40 = vector.broadcast %38 : vector<1x16x32xf32> to vector<8x16x32xf32>
    %41 = arith.mulf %40, %39 : vector<8x16x32xf32>
    %cst_25 = arith.constant dense<0.000000e+00> : vector<8x16xf32>
    %42 = vector.multi_reduction <add>, %41, %cst_25 [2] : vector<8x16x32xf32> to vector<8x16xf32>
    %cst_26 = arith.constant dense<0.000000e+00> : vector<8xf32>
    %43 = vector.multi_reduction <add>, %42, %cst_26 [1] : vector<8x16xf32> to vector<8xf32>
    %44 = vector.shape_cast %43 : vector<8xf32> to vector<8x1xf32>
    %c0_27 = arith.constant 0 : index
    %c0_28 = arith.constant 0 : index
    %45 = vector.load %arg5[%c0_27, %c0_28] : memref<8x1xf32, #tpu.memory_space<vmem>>, vector<8x1xf32>
    %46 = arith.addf %44, %45 : vector<8x1xf32>
    %c0_29 = arith.constant 0 : index
    %c0_30 = arith.constant 0 : index
    %47 = vector.load %arg6[%c0_29, %c0_30] : memref<8x1xf32, #tpu.memory_space<vmem>>, vector<8x1xf32>
    tpu.vector_store %arg6[%c0_29, %c0_30], %46 {strides = array<i32>} : memref<8x1xf32, #tpu.memory_space<vmem>>, vector<8x1xf32>,
    return
  }
}

</mosaic_0001>

<bundles_post_ra>
// kernel: gcn_forward.1
= control target key start
LH: loop header
LB: loop body
LE: loop exit
PB: predicated region body
PF: predicated region fallthrough
CT: control target
= control target key end

     0   :  { %11 = vsyncpa [#allocation3], 0  ;;  %s1039_s0 = inlined_call_operand.hbm [shape: f32[16,16], index: 0, kind: input, shape index: {}]   ;;  %s1040_s1 = inlined_call_operand.hbm [shape: f32[16,32], index: 1, kind: input, shape index: {}]   ;;  %s1041_s2 = inlined_call_operand.hbm [shape: f32[2,32,32], index: 2, kind: input, shape index: {}]   ;;  %s1042_s3 = inlined_call_operand.vmem [shape: f32[2,1,32], index: 3, kind: input, shape index: {}]   ;;  %s1043_s4 = inlined_call_operand.hbm [shape: f32[8,16,32], index: 4, kind: input, shape index: {}]   ;;  %s1044_s5 = inlined_call_operand.vmem [shape: f32[8,1], index: 5, kind: input, shape index: {}]   ;;  %s1045_s6 = inlined_call_operand.vmem [shape: f32[8,1], index: 6, kind: output, shape index: {}]  }
   0x1   :  { %12 = vsyncpa [#allocation5], 0 }
   0x2   :  { %13 = vsyncpa [#allocation8], 0  ;;  %s857_s21 = smov [#allocation4]   ;;  %s858_s23 = smov [#allocation2]  }
   0x3   :  { %s31_s22 = sshll.u32 %s857_s21, 4  ;;  %s19_s24 = sshll.u32 %s858_s23, 4  ;;  %s32_s22 = int_to_ptr.vmem [resolvable:$true] %s31_s22  ;;  %s898_s24 = int_to_ptr.vmem [resolvable:$true] %s19_s24 }
   0x4   :  { %s763_s27 = scalar_lea.hbm %s1040_s1, 256 }
   0x5   :  { %p764_p0 = scmp.ne.s32.totalorder %s1040_s1, %s763_s27  ;;  %p767_p1 = scmp.lt.u32.totalorder %s763_s27, %s1040_s1 }
   0x7   :  { %p769_p2 = pnand %p767_p1, %p764_p0 }
   0x9   :  { %772 = shalt.err (!%p769_p2)
}
   0xa   :  { %s773_s8 = scalar_lea.vmem %s32_s22, 256  ;;  %p778_p4 = scmp.lt.s32.totalorder %s32_s22, %s32_s22 }
   0xb   :  { %p774_p3 = scmp.ne.s32.totalorder %s32_s22, %s773_s8  ;;  %p779_p5 = scmp.lt.s32.totalorder %s773_s8, %s773_s8 }
   0xd   :  { %p780_p6 = por %p779_p5, %p778_p4 }
   0xf   :  { %p781_p7 = pnand %p780_p6, %p774_p3 }
  0x11   :  { %784 = shalt.err (!%p781_p7)
}
  0x12   :  { %s859_s9 = smov 128   ;;  %s860_s10 = smov 8  }
  0x13   :  { %37 = dma.hbm_to_vmem [thread:$0]  %s1040_s1, 256, %s32_s22, [#allocation5], %s859_s9, %s859_s9, %s860_s10  }
  0x14   :  { %s785_s15 = scalar_lea.hbm %s1039_s0, 256 }
  0x15   :  { %p786_p8 = scmp.ne.s32.totalorder %s1039_s0, %s785_s15  ;;  %p789_p9 = scmp.lt.u32.totalorder %s785_s15, %s1039_s0 }
  0x17   :  { %p791_p10 = pnand %p789_p9, %p786_p8 }
  0x19   :  { %794 = shalt.err (!%p791_p10)
}
  0x1a   :  { %s795_s20 = scalar_lea.vmem %s898_s24, 256  ;;  %p800_p12 = scmp.lt.s32.totalorder %s898_s24, %s898_s24 }
  0x1b   :  { %p796_p11 = scmp.ne.s32.totalorder %s898_s24, %s795_s20  ;;  %p801_p13 = scmp.lt.s32.totalorder %s795_s20, %s795_s20 }
  0x1d   :  { %p802_p0 = por %p801_p13, %p800_p12 }
  0x1f   :  { %p803_p1 = pnand %p802_p0, %p796_p11 }
  0x21   :  { %806 = shalt.err (!%p803_p1)
}
  0x22   :  { %25 = dma.hbm_to_vmem [thread:$0]  %s1039_s0, 256, %s898_s24, [#allocation3], %s859_s9, %s859_s9, %s860_s10  }
  0x23   :  { %s861_s22 = smov [#allocation6]   ;;  %s862_s25 = smov [#allocation7]  }
  0x24   :  { %s43_s23 = sshll.u32 %s861_s22, 4  ;;  %s57_s26 = sshll.u32 %s862_s25, 4  ;;  %s44_s23 = int_to_ptr.vmem [resolvable:$true] %s43_s23  ;;  %s935_s26 = int_to_ptr.vmem [resolvable:$true] %s57_s26 }
  0x25   :  { %s807_s29 = scalar_lea.hbm %s1041_s2, 1024 }
  0x26   :  { %p808_p2 = scmp.ne.s32.totalorder %s1041_s2, %s807_s29  ;;  %p811_p3 = scmp.lt.u32.totalorder %s807_s29, %s1041_s2 }
  0x28   :  { %p813_p4 = pnand %p811_p3, %p808_p2 }
  0x2a   :  { %816 = shalt.err (!%p813_p4)
}
  0x2b   :  { %s817_s0 = scalar_lea.vmem %s44_s23, 1024  ;;  %p822_p6 = scmp.lt.s32.totalorder %s44_s23, %s44_s23 }
  0x2c   :  { %p818_p5 = scmp.ne.s32.totalorder %s44_s23, %s817_s0  ;;  %p823_p7 = scmp.lt.s32.totalorder %s817_s0, %s817_s0 }
  0x2e   :  { %p824_p8 = por %p823_p7, %p822_p6 }
  0x30   :  { %p825_p9 = pnand %p824_p8, %p818_p5 }
  0x32   :  { %828 = shalt.err (!%p825_p9)
}
  0x33   :  { %49 = dma.hbm_to_vmem [thread:$0]  %s1041_s2, 1024, %s44_s23, [#allocation5], %s859_s9, %s859_s9, %s860_s10  }
  0x34   :  { %s829_s15 = scalar_lea.hbm %s1043_s4, 2048 }
  0x35   :  { %p830_p10 = scmp.ne.s32.totalorder %s1043_s4, %s829_s15  ;;  %p833_p11 = scmp.lt.u32.totalorder %s829_s15, %s1043_s4 }
  0x37   :  { %p835_p12 = pnand %p833_p11, %p830_p10 }
  0x39   :  { %838 = shalt.err (!%p835_p12)
}
  0x3a   :  { %s839_s20 = scalar_lea.vmem %s935_s26, 2048  ;;  %p844_p0 = scmp.lt.s32.totalorder %s935_s26, %s935_s26 }
  0x3b   :  { %p840_p13 = scmp.ne.s32.totalorder %s935_s26, %s839_s20  ;;  %p845_p1 = scmp.lt.s32.totalorder %s839_s20, %s839_s20 }
  0x3d   :  { %p846_p2 = por %p845_p1, %p844_p0 }
  0x3f   :  { %p847_p3 = pnand %p846_p2, %p840_p13 }
  0x41   :  { %850 = shalt.err (!%p847_p3)
}
  0x42   :  { %63 = dma.hbm_to_vmem [thread:$0]  %s1043_s4, 2048, %s935_s26, [#allocation8], %s859_s9, %s859_s9, %s860_s10  }
  0x43   :  { %851 = dma.done.wait [#allocation3], 256  }
  0x44   :  { %852 = vsyncadd [#allocation3], 4294967040 }
  0x45   :  { %853 = dma.done.wait [#allocation5], 1280  }
  0x46   :  { %854 = vsyncadd [#allocation5], 4294966016 }
  0x47   :  { %855 = dma.done.wait [#allocation8], 2048  }
  0x48   :  { %856 = vsyncadd [#allocation8], 4294965248  ;;  %v78_v0 = vlaneseq  ;;  %v83_v7 = vld [vmem:[#allocation2] sm:$0xff]  ;;  %v84_v8 = vld [vmem:[#allocation2 + $0x8] sm:$0xff]  ;;  %vm91_vm2 = vcmask 130048   ;;  %vm206_vm3 = vcmask 261120  }
  0x49   :  { %v87_v9 = vadd.f32 1.0, %v83_v7  ;;  %v88_v10 = vadd.f32 1.0, %v84_v8  ;;  %v112_v16 = vld [vmem:[#allocation4] sm:$0xff]  ;;  %v113_v17 = vld [vmem:[#allocation4 + $0x8] sm:$0xff]  ;;  %v195_v19 = vld [vmem:[#allocation6] sm:$0xff]  ;;  %vm566_vm4 = vcmask 130112  }
  0x4a   :  { %v79_v1 = vshrl.u32 %v78_v0, 7  ;;  %v82_v2 = vand.u32 127, %v78_v0  ;;  %v727_v18 = vpack.c.bf16 %v113_v17, %v112_v16  ;;  %v196_v20 = vld [vmem:[#allocation6 + $0x8] sm:$0xff]  ;;  %v197_v35 = vld [vmem:[#allocation6 + $0x10] sm:$0xff]  ;;  %v198_v36 = vld [vmem:[#allocation6 + $0x18] sm:$0xff]  ;;  %vm631_vm5 = vcmask 1041409  }
  0x4b   :  { %v731_v21 = vpack.c.bf16 %v196_v20, %v195_v19  ;;  %v735_v39 = vpack.c.bf16 %v198_v36, %v197_v35  ;;  %v662_v42 = vld [vmem:[%s1042_s3] ss:$0 sm:$0xff]  ;;  %v367_v49 = vld [vmem:[#allocation6 + $0x28] sm:$0xff]  ;;  %v368_v53 = vld [vmem:[#allocation6 + $0x30] sm:$0xff]  ;;  %vm633_vm6 = vcmask 1042434   ;;  %vm635_vm7 = vcmask 1043459  }
  0x4c   :  { %v972_v3 = vsub.s32 %v82_v2, %v79_v1  ;;  %v561_v4 = vadd.s32 4294967288, %v82_v2  ;;  %v80_v5 = vadd.s32 8, %v79_v1  ;;  %vm85_vm0 = vcmp.eq.s32.totalorder %v79_v1, %v82_v2  ;;  %728 = vmatprep.subr.bf16.mxu1 %v727_v18  ;;  %v366_v48 = vld [vmem:[#allocation6 + $0x20] sm:$0xff]  ;;  %v369_v54 = vld [vmem:[#allocation6 + $0x38] sm:$0xff]  ;;  %v462_v63 = vld [vmem:[#allocation7 + $0x8] sm:$0xff] }
  0x4d   :  { %v89_v11 = vsel %vm85_vm0, %v87_v9, %v83_v7  ;;  %730 = vmatpush3.bf16.msra.mxu1 %v727_v18  ;;  %v743_v52 = vpack.c.bf16 %v367_v49, %v366_v48  ;;  %v747_v55 = vpack.c.bf16 %v369_v54, %v368_v53  ;;  %v668_v58 = vld [vmem:[%s1042_s3 + $0x1] ss:$0 sm:$0xff]  ;;  %v468_v19 = vld [vmem:[#allocation7 + $0x38] sm:$0xff]  ;;  %vm637_vm8 = vcmask 1044484  }
  0x4e   :  { %v974_v6 = vsub.s32 %v561_v4, %v79_v1  ;;  %vm86_vm1 = vcmp.eq.s32.totalorder %v80_v5, %v82_v2  ;;  %v92_v13 = vsel %vm91_vm2, %v89_v11, 0.0  ;;  %732 = vmatprep.subr.bf16.mxu1 %v731_v21  ;;  %v463_v1 = vld [vmem:[#allocation7 + $0x10] sm:$0xff]  ;;  %v464_v4 = vld [vmem:[#allocation7 + $0x18] sm:$0xff]  ;;  %v465_v7 = vld [vmem:[#allocation7 + $0x20] sm:$0xff]  ;;  %vm639_vm9 = vcmask 1045509  }
  0x4f   :  { %v90_v12 = vsel %vm86_vm1, %v88_v10, %v84_v8  ;;  %93 = vadd.xlane.f32.xlu0 %v92_v13  ;;  %v469_v20 = vld [vmem:[#allocation7 + $0x40] sm:$0xff]  ;;  %vm641_vm10 = vcmask 1046534   ;;  %vm643_vm11 = vcmask 1047559   ;;  %vm651_vm12 = vcmask 7168  }
  0x50   :  { %v95_v14 = vsel %vm91_vm2, %v90_v12, 0.0 }
  0x51   :  { %v98_v15 = vadd.f32 %v95_v14, %v92_v13  ;;  %v466_v13 = vld [vmem:[#allocation7 + $0x28] sm:$0xff] }
  0x53   :  { %96 = vadd.xlane.f32.xlu0 %v95_v14  ;;  %v99_v22 = vrot.slane %v98_v15, 4  ;;  %v467_v14 = vld [vmem:[#allocation7 + $0x30] sm:$0xff] }
  0x55   :  { %v100_v23 = vadd.f32 %v99_v22, %v98_v15 }
  0x57   :  { %v101_v24 = vrot.slane %v100_v23, 2 }
  0x59   :  { %v102_v25 = vadd.f32 %v101_v24, %v100_v23 }
  0x5b   :  { %v103_v26 = vrot.slane %v102_v25, 1 }
  0x5d   :  { %v104_v27 = vadd.f32 %v103_v26, %v102_v25  ;;  %v470_v25 = vld [vmem:[#allocation7 + $0x48] sm:$0xff]  ;;  %v471_v26 = vld [vmem:[#allocation7 + $0x50] sm:$0xff] }
  0x5f   :  { %757 = vrsqrt.f32 %v104_v27 }
  0x69   :  { %v758_v30 = vpop.eup %757 }
  0xdc   :  { %v94_v28 = vpop.xlane.xlu0 %93 }
  0xdd   :  { %759 = vrsqrt.f32 %v94_v28 }
  0xe0   :  { %v97_v29 = vpop.xlane.xlu0 %96 }
  0xe1   :  { %761 = vrsqrt.f32 %v97_v29 }
  0xe7   :  { %v760_v31 = vpop.eup %759 }
  0xe8   :  { %v107_v32 = vmul.f32 %v760_v31, %v89_v11  ;;  %v472_v31 = vld [vmem:[#allocation7 + $0x58] sm:$0xff] }
  0xea   :  { %v110_v33 = vmul.f32 %v758_v30, %v107_v32  ;;  %v473_v32 = vld [vmem:[#allocation7 + $0x60] sm:$0xff] }
  0xeb   :  { %v762_v34 = vpop.eup %761 }
  0xec   :  { %695 = vmatprep.mubr.msk.f32.mxu1 %vm91_vm2, %v110_v33  ;;  %713 = vmatprep.mubr.msk.f32.mxu0 %vm91_vm2, %v110_v33  ;;  %v108_v37 = vmul.f32 %v762_v34, %v90_v12 }
  0xee   :  { %v111_v38 = vmul.f32 %v758_v30, %v108_v37  ;;  %v461_v37 = vld [vmem:[#allocation7] sm:$0xff] }
  0xf0   :  { %696 = vmatmul.mubr.msk.f32.vlgmr.msra.gmra.mrb[0].mxu1 %vm91_vm2, %v111_v38 }
  0xf1   :  { %734 = vmatpush3.bf16.msra.mxu1 %v731_v21 }
  0xf2   :  { %736 = vmatprep.subr.bf16.mxu1 %v735_v39 }
  0xf5   :  { %738 = vmatpush3.bf16.msra.mxu1 %v735_v39 }
 0x1c3   :  { %v697_v40 = vpop.f32.mrb[0].mxu1 }
 0x1c4   :  { %v186_v41 = vpop.f32.mrb[1].mxu1 }
 0x1c5   :  { %706 = vmatprep.mubr.msk.f32.mxu1 %vm206_vm3, %v186_v41 }
 0x1c6   :  { %707 = vmatmul.mubr.msk.f32.vlgmr.msra.gmra.mrb[2].mxu1 %vm206_vm3, %v697_v40 }
 0x299   :  { %v708_v43 = vpop.f32.mrb[2].mxu1 }
 0x29a   :  { %v285_v44 = vadd.f32 %v708_v43, %v662_v42  ;;  %v279_v45 = vpop.f32.mrb[3].mxu1  ;;  %v474_v43 = vld [vmem:[#allocation7 + $0x68] sm:$0xff] }
 0x29b   :  { %v280_v46 = vadd.f32 %v662_v42, %v279_v45 }
 0x29c   :  { %v289_v47 = vmax.f32 %v285_v44, 0.0 }
 0x29d   :  { %v288_v50 = vmax.f32 %v280_v46, 0.0 }
 0x29f   :  { %v739_v51 = vpack.c.bf16 %v289_v47, %v288_v50  ;;  %v476_v47 = vld [vmem:[#allocation7 + $0x78] sm:$0xff] }
 0x2a1   :  { %740 = vmatprep.subr.bf16.mxu0 %v739_v51 }
 0x2a2   :  { %742 = vmatpush3.bf16.msra.mxu0 %v739_v51 }
 0x2a3   :  { %744 = vmatprep.subr.bf16.mxu0 %v743_v52 }
 0x2a5   :  { %714 = vmatmul.mubr.msk.f32.vlgmr.msra.gmra.mrb[0].mxu0 %vm91_vm2, %v111_v38  ;;  %v475_v38 = vld [vmem:[#allocation7 + $0x70] sm:$0xff] }
 0x2a6   :  { %746 = vmatpush3.bf16.msra.mxu0 %v743_v52 }
 0x2a7   :  { %748 = vmatprep.subr.bf16.mxu0 %v747_v55 }
 0x2aa   :  { %750 = vmatpush3.bf16.msra.mxu0 %v747_v55 }
 0x378   :  { %v715_v56 = vpop.f32.mrb[0].mxu0 }
 0x379   :  { %v356_v57 = vpop.f32.mrb[1].mxu0 }
 0x37a   :  { %724 = vmatprep.mubr.msk.f32.mxu0 %vm206_vm3, %v356_v57 }
 0x37b   :  { %725 = vmatmul.mubr.msk.f32.vlgmr.msra.gmra.mrb[2].mxu0 %vm206_vm3, %v715_v56 }
 0x44e   :  { %v726_v59 = vpop.f32.mrb[2].mxu0 }
 0x44f   :  { %v456_v60 = vadd.f32 %v726_v59, %v668_v58  ;;  %v450_v61 = vpop.f32.mrb[3].mxu0 }
 0x450   :  { %v451_v62 = vadd.f32 %v668_v58, %v450_v61 }
 0x451   :  { %v460_v0 = vmax.f32 %v456_v60, 0.0 }
 0x452   :  { %v459_v2 = vmax.f32 %v451_v62, 0.0 }
 0x453   :  { %v478_v5 = vmul.f32 %v462_v63, %v460_v0  ;;  %v480_v10 = vmul.f32 %v464_v4, %v460_v0  ;;  %v482_v16 = vmul.f32 %v466_v13, %v460_v0  ;;  %v484_v22 = vmul.f32 %v468_v19, %v460_v0 }
 0x454   :  { %v479_v8 = vmul.f32 %v463_v1, %v459_v2  ;;  %v481_v12 = vmul.f32 %v465_v7, %v459_v2  ;;  %v483_v18 = vmul.f32 %v467_v14, %v459_v2  ;;  %v485_v24 = vmul.f32 %v469_v20, %v459_v2 }
 0x455   :  { %v496_v9 = vsel %vm206_vm3, %v478_v5, 0.0  ;;  %v502_v15 = vsel %vm206_vm3, %v480_v10, 0.0  ;;  %v508_v21 = vsel %vm206_vm3, %v482_v16, 0.0  ;;  %v514_v27 = vsel %vm206_vm3, %v484_v22, 0.0 }
 0x456   :  { %497 = vadd.xlane.f32.xlu1 %v496_v9  ;;  %v499_v11 = vsel %vm206_vm3, %v479_v8, 0.0  ;;  %v505_v17 = vsel %vm206_vm3, %v481_v12, 0.0  ;;  %v511_v23 = vsel %vm206_vm3, %v483_v18, 0.0  ;;  %v486_v28 = vmul.f32 %v470_v25, %v460_v0 }
 0x457   :  { %500 = vadd.xlane.f32.xlu0 %v499_v11  ;;  %v517_v29 = vsel %vm206_vm3, %v485_v24, 0.0  ;;  %v487_v30 = vmul.f32 %v471_v26, %v459_v2  ;;  %v488_v34 = vmul.f32 %v472_v31, %v460_v0  ;;  %v489_v36 = vmul.f32 %v473_v32, %v459_v2 }
 0x458   :  { %v520_v33 = vsel %vm206_vm3, %v486_v28, 0.0  ;;  %v477_v40 = vmul.f32 %v461_v37, %v459_v2  ;;  %v491_v42 = vmul.f32 %v475_v38, %v459_v2  ;;  %v490_v45 = vmul.f32 %v474_v43, %v460_v0  ;;  %v649_v37 = vld [vmem:[%s1044_s5] sm:$0xff] }
 0x459   :  { %v523_v35 = vsel %vm206_vm3, %v487_v30, 0.0  ;;  %v526_v39 = vsel %vm206_vm3, %v488_v34, 0.0  ;;  %v529_v41 = vsel %vm206_vm3, %v489_v36, 0.0  ;;  %v492_v49 = vmul.f32 %v476_v47, %v460_v0 }
 0x45a   :  { %503 = vadd.xlane.f32.xlu1 %v502_v15  ;;  %v493_v44 = vsel %vm206_vm3, %v477_v40, 0.0  ;;  %v535_v46 = vsel %vm206_vm3, %v491_v42, 0.0  ;;  %v532_v48 = vsel %vm206_vm3, %v490_v45, 0.0 }
 0x45b   :  { %506 = vadd.xlane.f32.xlu0 %v505_v17  ;;  %v538_v50 = vsel %vm206_vm3, %v492_v49, 0.0 }
 0x45e   :  { %509 = vadd.xlane.f32.xlu1 %v508_v21 }
 0x45f   :  { %512 = vadd.xlane.f32.xlu0 %v511_v23 }
 0x462   :  { %515 = vadd.xlane.f32.xlu1 %v514_v27 }
 0x463   :  { %518 = vadd.xlane.f32.xlu0 %v517_v29 }
 0x466   :  { %521 = vadd.xlane.f32.xlu1 %v520_v33 }
 0x467   :  { %524 = vadd.xlane.f32.xlu0 %v523_v35 }
 0x46a   :  { %527 = vadd.xlane.f32.xlu1 %v526_v39 }
 0x46b   :  { %530 = vadd.xlane.f32.xlu0 %v529_v41 }
 0x46e   :  { %494 = vadd.xlane.f32.xlu1 %v493_v44 }
 0x46f   :  { %536 = vadd.xlane.f32.xlu0 %v535_v46 }
 0x472   :  { %533 = vadd.xlane.f32.xlu1 %v532_v48 }
 0x476   :  { %539 = vadd.xlane.f32.xlu1 %v538_v50 }
 0x4e3   :  { %v498_v51 = vpop.xlane.xlu1 %497 }
 0x4e4   :  { %v501_v52 = vpop.xlane.xlu0 %500  ;;  %v565_v17 = vrot.slane %v498_v51, %v974_v6 }
 0x4e5   :  { %v571_v54 = vrot.slane %v501_v52, %v972_v3 }
 0x4e7   :  { %v504_v53 = vpop.xlane.xlu1 %503 }
 0x4e8   :  { %v575_v55 = vrot.slane %v504_v53, %v974_v6  ;;  %v507_v56 = vpop.xlane.xlu0 %506 }
 0x4e9   :  { %v580_v59 = vrot.slane %v507_v56, %v972_v3 }
 0x4ea   :  { %v576_v57 = vsel %vm566_vm4, %v575_v55, %v571_v54 }
 0x4eb   :  { %v510_v58 = vpop.xlane.xlu1 %509 }
 0x4ec   :  { %v584_v60 = vrot.slane %v510_v58, %v974_v6  ;;  %v513_v61 = vpop.xlane.xlu0 %512 }
 0x4ed   :  { %v589_v0 = vrot.slane %v513_v61, %v972_v3 }
 0x4ee   :  { %v585_v62 = vsel %vm566_vm4, %v584_v60, %v580_v59 }
 0x4ef   :  { %v516_v63 = vpop.xlane.xlu1 %515 }
 0x4f0   :  { %v593_v1 = vrot.slane %v516_v63, %v974_v6  ;;  %v519_v2 = vpop.xlane.xlu0 %518 }
 0x4f1   :  { %v598_v7 = vrot.slane %v519_v2, %v972_v3 }
 0x4f2   :  { %v594_v4 = vsel %vm566_vm4, %v593_v1, %v589_v0 }
 0x4f3   :  { %v522_v5 = vpop.xlane.xlu1 %521 }
 0x4f4   :  { %v602_v8 = vrot.slane %v522_v5, %v974_v6  ;;  %v525_v9 = vpop.xlane.xlu0 %524 }
 0x4f5   :  { %v607_v12 = vrot.slane %v525_v9, %v972_v3 }
 0x4f6   :  { %v603_v10 = vsel %vm566_vm4, %v602_v8, %v598_v7 }
 0x4f7   :  { %v528_v11 = vpop.xlane.xlu1 %527 }
 0x4f8   :  { %v611_v13 = vrot.slane %v528_v11, %v974_v6  ;;  %v531_v15 = vpop.xlane.xlu0 %530 }
 0x4f9   :  { %v616_v22 = vrot.slane %v531_v15, %v972_v3 }
 0x4fa   :  { %v612_v14 = vsel %vm566_vm4, %v611_v13, %v607_v12 }
 0x4fb   :  { %v495_v16 = vpop.xlane.xlu1 %494 }
 0x4fc   :  { %v560_v18 = vrot.slane %v495_v16, %v972_v3  ;;  %v537_v25 = vpop.xlane.xlu0 %536 }
 0x4fd   :  { %v625_v31 = vrot.slane %v537_v25, %v972_v3 }
 0x4fe   :  { %v567_v19 = vsel %vm566_vm4, %v565_v17, %v560_v18 }
 0x4ff   :  { %v632_v20 = vsel %vm631_vm5, %v576_v57, %v567_v19  ;;  %v534_v21 = vpop.xlane.xlu1 %533 }
 0x500   :  { %v634_v23 = vsel %vm633_vm6, %v585_v62, %v632_v20  ;;  %v620_v24 = vrot.slane %v534_v21, %v974_v6 }
 0x501   :  { %v636_v26 = vsel %vm635_vm7, %v594_v4, %v634_v23 }
 0x502   :  { %v621_v27 = vsel %vm566_vm4, %v620_v24, %v616_v22  ;;  %v638_v28 = vsel %vm637_vm8, %v603_v10, %v636_v26 }
 0x503   :  { %v540_v29 = vpop.xlane.xlu1 %539  ;;  %v640_v30 = vsel %vm639_vm9, %v612_v14, %v638_v28 }
 0x504   :  { %v629_v32 = vrot.slane %v540_v29, %v974_v6  ;;  %v642_v33 = vsel %vm641_vm10, %v621_v27, %v640_v30 }
 0x506   :  { %v630_v34 = vsel %vm566_vm4, %v629_v32, %v625_v31 }
 0x507   :  { %v644_v35 = vsel %vm643_vm11, %v630_v34, %v642_v33 }
 0x508   :  { %v646_v36 = vsel %vm91_vm2, %v644_v35, 0.0 }
 0x509   :  { %647 = vadd.xlane.f32.xlu0 %v646_v36 }
 0x596   :  { %v648_v38 = vpop.xlane.xlu0 %647 }
 0x597   :  { %v650_v39 = vadd.f32 %v649_v37, %v648_v38 }
 0x599   :  { %652 = vst.msk [vmem:[%s1045_s6] sm:$0xff] %vm651_vm12, %v650_v39 }
 0x59a   :  { %657 = vsyncpa [#allocation3], 1 }
 0x59b   :  { %658 = vsyncpa [#allocation5], 1 }
 0x59c   :  { %659 = vsyncpa [#allocation8], 1 }

</bundles_post_ra>
